<compile_context>
chip_gen: v5e
topology: v5e:2x2
jax: 0.10.0
libtpu: 0.0.40
codegen_flags: <defaults>
</compile_context>

<pallas_src>
import functools

import jax
import jax.numpy as jnp
from jax import lax
from jax.experimental import pallas as pl
from jax.experimental.pallas import tpu as pltpu

_VMEM_CEIL = 48 * 2**20   # conservative scoped-VMEM ceiling; fits v5e/v6e/v7x physical VMEM
_LANE = 128


def _round_up(x, m):
    return ((x + m - 1) // m) * m


def _leaky_relu(x, slope=0.2):
    # max(x, 0.2*x) == LeakyReLU(0.2)
    return jnp.maximum(x, slope * x)


def _device_defaults():
    """(sub_tile_rows, use_bf16_activations) chosen per TPU generation."""
    try:
        kind = jax.devices()[0].device_kind.lower()
    except Exception:
        kind = ""
    legacy = any(t in kind for t in ("v2", "v3", "v4", "v5"))
    # v5e and older: 128-wide MXU, no bf16 VPU -> M=128 sub-tiles, f32 activations.
    # v6e / v7x:     256-wide MXU, bf16 VPU    -> M=256 sub-tiles, bf16 activations.
    return (128, False) if legacy else (256, True)


@functools.lru_cache(maxsize=None)
def _single_buffer_weights_supported():
    """Probe (once, eagerly) whether pipeline_mode=pl.Buffered(1) works for
    constant-index inputs on this jax/libtpu; fall back to default double
    buffering if anything about it is unsupported."""
    try:
        wspec = pl.BlockSpec((8, 128), lambda i: (0, 0), pipeline_mode=pl.Buffered(1))

        def _k(w_ref, o_ref):
            o_ref[...] = w_ref[...] * 2.0

        out = pl.pallas_call(
            _k,
            out_shape=jax.ShapeDtypeStruct((16, 128), jnp.float32),
            grid=(2,),
            in_specs=[wspec],
            out_specs=pl.BlockSpec((8, 128), lambda i: (i, 0)),
        )(jnp.ones((8, 128), jnp.float32))
        return bool(jnp.all(jax.block_until_ready(out) == 2.0))
    except Exception:
        return False


def _pick_sub_tile(bt, pref):
    for s in (pref, 128, 64, 32, 16, 8):
        if s <= pref and s <= bt and bt % s == 0:
            return s
    return bt


def _vmem_need(bt, sub, in_dim, h1, h2, x_itemsize, wbuf):
    x_b = 2 * bt * in_dim * x_itemsize                    # double-buffered x tile
    o_b = 2 * 8 * bt * 4                                  # double-buffered (1,1,bt) out tile
    w_b = wbuf * ((in_dim * h1 + h1 * h2 + 8 * h2) * 2    # bf16 weights
                  + (h1 + h2 + 1) * 4)                    # f32 biases
    a_b = 6 * sub * max(h1, h2) * 4                       # live activations / regalloc slack
    return x_b + o_b + w_b + a_b


def _make_kernel(sub, num_sub, act_dtype):
    mm = jnp.bfloat16  # MXU operand dtype (f32 accumulation via preferred_element_type)

    def kernel(x_ref, w1_ref, b1_ref, w2_ref, b2_ref, w3_ref, b3_ref, o_ref):
        # Resident parameters: constant index_map -> fetched once, reused every grid step.
        w1 = w1_ref[...]                      # (in_dim, h1) bf16
        w2 = w2_ref[...]                      # (h1,  h2)    bf16
        w3 = w3_ref[...]                      # (8,   h2)    bf16 (row 0 = real head row)
        b1 = b1_ref[...].astype(act_dtype)    # (1, h1)
        b2 = b2_ref[...].astype(act_dtype)    # (1, h2)
        b3 = b3_ref[...]                      # (1, 1) f32

        for c in range(num_sub):              # static python loop -> static slices
            sl = slice(c * sub, (c + 1) * sub)
            x = x_ref[sl, :].astype(mm)        # in-kernel cast (no wrapper-side cast pass)

            # Layer 1: Linear (MXU) + bias + LeakyReLU(0.2)
            h = jnp.dot(x, w1, preferred_element_type=jnp.float32)
            h = _leaky_relu(h.astype(act_dtype) + b1)

            # Layer 2: Linear (MXU) + bias + LeakyReLU(0.2)
            h = jnp.dot(h.astype(mm), w2, preferred_element_type=jnp.float32)
            h = _leaky_relu(h.astype(act_dtype) + b2)

            # Head (out_features = 1): NT dot (8,h2) x (sub,h2)^T -> (8, sub); row 0 is
            # the real output.  This puts the batch on the lane axis so the store below
            # is lane-dense (unmasked vst, dense HBM writeback).
            z = lax.dot_general(w3, h.astype(mm),
                                (((1,), (1,)), ((), ())),
                                preferred_element_type=jnp.float32)
            z = z[0:1, :] + b3                                            # (1, sub) f32
            o_ref[:, :, sl] = jax.nn.sigmoid(z).reshape(1, 1, sub).astype(o_ref.dtype)

    return kernel


def prepare_params(params):
    """Hoist all layout work out of the hot path.

    params: PyTorch layout (w1 (h1,in), b1 (h1,), w2 (h2,h1), b2 (h2,), w3 (1,h2), b3 (1,)).
    Returns (in,out)-layout bf16 weights, (1,out) f32 biases, head padded to (8, h2) bf16,
    hidden dims zero-padded to multiples of 128 (exact: padded activations are
    leaky(0)=0 and padded head columns are 0).
    """
    w1, b1, w2, b2, w3, b3 = params
    h1, in_dim = w1.shape
    h2 = w2.shape[0]
    rh1 = _round_up(h1, _LANE)
    rh2 = _round_up(h2, _LANE)

    def pad_to(a, shape):
        return jnp.pad(a, [(0, s - d) for d, s in zip(a.shape, shape)])

    w1t = pad_to(w1.T, (in_dim, rh1)).astype(jnp.bfloat16)
    b1r = pad_to(b1.reshape(1, -1), (1, rh1)).astype(jnp.float32)
    w2t = pad_to(w2.T, (rh1, rh2)).astype(jnp.bfloat16)
    b2r = pad_to(b2.reshape(1, -1), (1, rh2)).astype(jnp.float32)
    w3p = pad_to(w3.reshape(1, -1), (8, rh2)).astype(jnp.bfloat16)
    b3r = b3.reshape(1, 1).astype(jnp.float32)
    return (w1t, b1r, w2t, b2r, w3p, b3r)


def linear_discriminator(x, kparams, *, batch_tile=1024):
    """Fused forward pass. x: (B, in_dim) float array; returns (B, 1) float32."""
    w1t, b1r, w2t, b2r, w3p, b3r = kparams
    B, in_dim = x.shape
    h1 = w1t.shape[1]
    h2 = w2t.shape[1]

    sub_pref, bf16_act = _device_defaults()
    act_dtype = jnp.bfloat16 if bf16_act else jnp.float32
    single_buf = _single_buffer_weights_supported()
    wbuf = 1 if single_buf else 2

    # --- batch-tile selection -------------------------------------------------
    # Keep >= 2 batch tiles whenever the batch is big enough, so the "parallel"
    # grid axis can shard across both v7x TensorCores.
    if B > 2 * sub_pref:
        cap = _round_up(pl.cdiv(B, 2), sub_pref)
    else:
        cap = _round_up(B, 8)
    bt = max(8, min(int(batch_tile), cap, 4096))
    align = sub_pref if bt >= sub_pref else 8
    bt = _round_up(bt, align)

    # Shrink the tile until tiles + resident weights fit the VMEM budget.
    sub = _pick_sub_tile(bt, sub_pref)
    while bt > align and _vmem_need(bt, sub, in_dim, h1, h2,
                                    x.dtype.itemsize, wbuf) > int(0.85 * _VMEM_CEIL):
        bt = max(align, _round_up(bt // 2, align))
        sub = _pick_sub_tile(bt, sub_pref)
    n_tiles = pl.cdiv(B, bt)
    num_sub = bt // sub

    vmem_limit = int(min(_VMEM_CEIL,
                         max(2 * _vmem_need(bt, sub, in_dim, h1, h2,
                                            x.dtype.itemsize, wbuf),
                             32 * 2**20)))

    def wspec(shape):
        imap = lambda i: (0,) * len(shape)
        if single_buf:  # resident weights: one VMEM buffer instead of two
            return pl.BlockSpec(shape, imap, pipeline_mode=pl.Buffered(1))
        return pl.BlockSpec(shape, imap)

    # TODO(synk): optional int8 weight path for v6e (MXU i8) is not implemented.
    out3 = pl.pallas_call(
        _make_kernel(sub, num_sub, act_dtype),
        out_shape=jax.ShapeDtypeStruct((n_tiles, 1, bt), jnp.float32),
        grid_spec=pltpu.PrefetchScalarGridSpec(
            num_scalar_prefetch=0,
            grid=(n_tiles,),
            in_specs=[
                pl.BlockSpec((bt, in_dim), lambda i: (i, 0)),  # x, native dtype, ragged tail masked
                wspec((in_dim, h1)),   # W1^T bf16
                wspec((1, h1)),        # b1   f32
                wspec((h1, h2)),       # W2^T bf16
                wspec((1, h2)),        # b2   f32
                wspec((8, h2)),        # W3 rows (row 0 real) bf16
                wspec((1, 1)),         # b3   f32
            ],
            out_specs=pl.BlockSpec((1, 1, bt), lambda i: (i, 0, 0)),
        ),
        compiler_params=pltpu.CompilerParams(
            dimension_semantics=("parallel",),
            vmem_limit_bytes=vmem_limit,
        ),
    )(x, w1t, b1r, w2t, b2r, w3p, b3r)

    out = out3.reshape(n_tiles * bt, 1)
    return out[:B] if n_tiles * bt != B else out


def init_params(key, in_dim, hidden_dim):
    """PyTorch-style init: U(-1/sqrt(fan_in), 1/sqrt(fan_in)), (out, in) weights."""
    dims = [(in_dim, hidden_dim), (hidden_dim, hidden_dim // 2), (hidden_dim // 2, 1)]
    params = []
    for (fan_in, fan_out) in dims:
        key, kw, kb = jax.random.split(key, 3)
        bound = 1.0 / (fan_in ** 0.5)
        w = jax.random.uniform(kw, (fan_out, fan_in), jnp.float32, -bound, bound)
        b = jax.random.uniform(kb, (fan_out,), jnp.float32, -bound, bound)
        params += [w, b]
    return tuple(params)


def reference_forward(x, params):
    """Pure-f32 JAX reference matching the PyTorch module."""
    w1, b1, w2, b2, w3, b3 = params
    h = x @ w1.T + b1
    h = jnp.where(h > 0, h, 0.2 * h)
    h = h @ w2.T + b2
    h = jnp.where(h > 0, h, 0.2 * h)
    return jax.nn.sigmoid(h @ w3.T + b3)


if __name__ == "__main__":
    key = jax.random.PRNGKey(0)
    k1, k2, k3, k4 = jax.random.split(key, 4)

    _single_buffer_weights_supported()  # prime the Buffered(1) probe outside of jit tracing

    # Test 1: small single-tile config (exercises hidden-dim padding: h2=64 -> 128).
    B, IN_DIM, HIDDEN = 16, 64, 128
    x = jax.random.normal(k1, (B, IN_DIM), jnp.float32)
    params = init_params(k2, IN_DIM, HIDDEN)
    kparams = prepare_params(params)
    fwd = jax.jit(functools.partial(linear_discriminator, batch_tile=1024))
    out = jax.block_until_ready(fwd(x, kparams))
    ref = reference_forward(x, params)
    assert out.shape == (B, 1), out.shape
    assert bool(jnp.all(jnp.isfinite(out)))
    # bf16 matmul operands / activations with f32 accumulation -> loosened tolerance.
    assert float(jnp.max(jnp.abs(out - ref))) < 2.5e-2, "mismatch vs reference (small)"

    # Test 2: ragged multi-tile batch (exercises >=2 tiles + masked partial last block).
    B2, IN2, HID2 = 600, 128, 256
    x2 = jax.random.normal(k3, (B2, IN2), jnp.float32)
    params2 = init_params(k4, IN2, HID2)
    kparams2 = prepare_params(params2)
    fwd2 = jax.jit(functools.partial(linear_discriminator, batch_tile=2048))
    out2 = jax.block_until_ready(fwd2(x2, kparams2))
    ref2 = reference_forward(x2, params2)
    assert out2.shape == (B2, 1), out2.shape
    assert bool(jnp.all(jnp.isfinite(out2)))
    assert float(jnp.max(jnp.abs(out2 - ref2))) < 2.5e-2, "mismatch vs reference (ragged)"

    print("KERNEL_OK")
</pallas_src>

<mosaic_0001>
module attributes {stable_mosaic.version = 11 : i64} {
  func.func @_k(%arg0: i32, %arg1: memref<8x128xf32, #tpu.memory_space<vmem>>, %arg2: memref<8x128xf32, #tpu.memory_space<vmem>>) attributes {dimension_semantics = [#tpu.dimension_semantics<arbitrary>], iteration_bounds = array<i64: 2>, scalar_prefetch = 0 : i64, scratch_operands = 0 : i64, tpu.core_type = #tpu.core_type<tc>, window_params = [{pipeline_mode = #tpu.pipeline_mode<synchronous>, transform_indices = @transform_0, window_bounds = array<i64: 8, 128>}, {transform_indices = @transform_1, window_bounds = array<i64: 8, 128>}]} {
    %c0 = arith.constant 0 : index
    %c0_0 = arith.constant 0 : index
    %0 = vector.load %arg1[%c0, %c0_0] : memref<8x128xf32, #tpu.memory_space<vmem>>, vector<8x128xf32>
    %cst = arith.constant 2.000000e+00 : f32
    %1 = vector.broadcast %cst : f32 to vector<8x128xf32>
    %2 = arith.mulf %0, %1 : vector<8x128xf32>
    %c0_1 = arith.constant 0 : index
    %c0_2 = arith.constant 0 : index
    %3 = vector.load %arg2[%c0_1, %c0_2] : memref<8x128xf32, #tpu.memory_space<vmem>>, vector<8x128xf32>
    tpu.vector_store %arg2[%c0_1, %c0_2], %2 {strides = array<i32>} : memref<8x128xf32, #tpu.memory_space<vmem>>, vector<8x128xf32>,
    return
  }
  func.func @transform_0(%arg0: i32) -> (i32, i32) {
    %c0_i32 = arith.constant 0 : i32
    %c0_i32_0 = arith.constant 0 : i32
    %c0_i32_1 = arith.constant 0 : i32
    return %c0_i32, %c0_i32_0 : i32, i32
  }
  func.func @transform_1(%arg0: i32) -> (i32, i32) {
    %c0_i32 = arith.constant 0 : i32
    %c0_i32_0 = arith.constant 0 : i32
    return %arg0, %c0_i32 : i32, i32
  }
}

module attributes {stable_mosaic.version = 11 : i64} {
  func.func @kernel(%arg0: i32, %arg1: memref<16x64xf32, #tpu.memory_space<vmem>>, %arg2: memref<64x128xbf16, #tpu.memory_space<vmem>>, %arg3: memref<1x128xf32, #tpu.memory_space<vmem>>, %arg4: memref<128x128xbf16, #tpu.memory_space<vmem>>, %arg5: memref<1x128xf32, #tpu.memory_space<vmem>>, %arg6: memref<8x128xbf16, #tpu.memory_space<vmem>>, %arg7: memref<1x1xf32, #tpu.memory_space<vmem>>, %arg8: memref<1x1x16xf32, #tpu.memory_space<vmem>>) attributes {dimension_semantics = [#tpu.dimension_semantics<parallel>], iteration_bounds = array<i64: 1>, scalar_prefetch = 0 : i64, scratch_operands = 0 : i64, tpu.core_type = #tpu.core_type<tc>, window_params = [{transform_indices = @transform_0, window_bounds = array<i64: 16, 64>}, {pipeline_mode = #tpu.pipeline_mode<synchronous>, transform_indices = @transform_1, window_bounds = array<i64: 64, 128>}, {pipeline_mode = #tpu.pipeline_mode<synchronous>, transform_indices = @transform_2, window_bounds = array<i64: 1, 128>}, {pipeline_mode = #tpu.pipeline_mode<synchronous>, transform_indices = @transform_3, window_bounds = array<i64: 128, 128>}, {pipeline_mode = #tpu.pipeline_mode<synchronous>, transform_indices = @transform_4, window_bounds = array<i64: 1, 128>}, {pipeline_mode = #tpu.pipeline_mode<synchronous>, transform_indices = @transform_5, window_bounds = array<i64: 8, 128>}, {pipeline_mode = #tpu.pipeline_mode<synchronous>, transform_indices = @transform_6, window_bounds = array<i64: 1, 1>}, {transform_indices = @transform_7, window_bounds = array<i64: 1, 1, 16>}]} {
    %c0 = arith.constant 0 : index
    %c0_0 = arith.constant 0 : index
    %0 = vector.load %arg2[%c0, %c0_0] : memref<64x128xbf16, #tpu.memory_space<vmem>>, vector<64x128xbf16>
    %c0_1 = arith.constant 0 : index
    %c0_2 = arith.constant 0 : index
    %1 = vector.load %arg4[%c0_1, %c0_2] : memref<128x128xbf16, #tpu.memory_space<vmem>>, vector<128x128xbf16>
    %c0_3 = arith.constant 0 : index
    %c0_4 = arith.constant 0 : index
    %2 = vector.load %arg6[%c0_3, %c0_4] : memref<8x128xbf16, #tpu.memory_space<vmem>>, vector<8x128xbf16>
    %c0_5 = arith.constant 0 : index
    %c0_6 = arith.constant 0 : index
    %3 = vector.load %arg3[%c0_5, %c0_6] : memref<1x128xf32, #tpu.memory_space<vmem>>, vector<1x128xf32>
    %4 = arith.truncf %3 : vector<1x128xf32> to vector<1x128xbf16>
    %c0_7 = arith.constant 0 : index
    %c0_8 = arith.constant 0 : index
    %5 = vector.load %arg5[%c0_7, %c0_8] : memref<1x128xf32, #tpu.memory_space<vmem>>, vector<1x128xf32>
    %6 = arith.truncf %5 : vector<1x128xf32> to vector<1x128xbf16>
    %c0_9 = arith.constant 0 : index
    %c0_10 = arith.constant 0 : index
    %7 = vector.load %arg7[%c0_9, %c0_10] : memref<1x1xf32, #tpu.memory_space<vmem>>, vector<1x1xf32>
    %c0_11 = arith.constant 0 : index
    %c0_12 = arith.constant 0 : index
    %8 = vector.load %arg1[%c0_11, %c0_12] : memref<16x64xf32, #tpu.memory_space<vmem>>, vector<16x64xf32>
    %9 = arith.truncf %8 : vector<16x64xf32> to vector<16x64xbf16>
    %cst = arith.constant dense<0.000000e+00> : vector<16x128xf32>
    %10 = tpu.matmul %9, %0, %cst {dimension_numbers = #tpu.dot_dimension_numbers<[1], [0], [0], [1], [0, 0, 1, 1], [], []>} : vector<16x64xbf16>, vector<64x128xbf16>, vector<16x128xf32> -> vector<16x128xf32>
    %11 = arith.truncf %10 : vector<16x128xf32> to vector<16x128xbf16>
    %12 = vector.broadcast %4 : vector<1x128xbf16> to vector<16x128xbf16>
    %13 = arith.addf %11, %12 : vector<16x128xbf16>
    %cst_13 = arith.constant 2.001950e-01 : bf16
    %14 = vector.broadcast %cst_13 : bf16 to vector<16x128xbf16>
    %15 = arith.mulf %14, %13 : vector<16x128xbf16>
    %16 = arith.maximumf %13, %15 : vector<16x128xbf16>
    %cst_14 = arith.constant dense<0.000000e+00> : vector<16x128xf32>
    %17 = tpu.matmul %16, %1, %cst_14 {dimension_numbers = #tpu.dot_dimension_numbers<[1], [0], [0], [1], [0, 0, 1, 1], [], []>} : vector<16x128xbf16>, vector<128x128xbf16>, vector<16x128xf32> -> vector<16x128xf32>
    %18 = arith.truncf %17 : vector<16x128xf32> to vector<16x128xbf16>
    %19 = vector.broadcast %6 : vector<1x128xbf16> to vector<16x128xbf16>
    %20 = arith.addf %18, %19 : vector<16x128xbf16>
    %cst_15 = arith.constant 2.001950e-01 : bf16
    %21 = vector.broadcast %cst_15 : bf16 to vector<16x128xbf16>
    %22 = arith.mulf %21, %20 : vector<16x128xbf16>
    %23 = arith.maximumf %20, %22 : vector<16x128xbf16>
    %cst_16 = arith.constant dense<0.000000e+00> : vector<8x16xf32>
    %24 = tpu.matmul %2, %23, %cst_16 {dimension_numbers = #tpu.dot_dimension_numbers<[1], [1], [0], [0], [0, 0, 1, 0], [], []>} : vector<8x128xbf16>, vector<16x128xbf16>, vector<8x16xf32> -> vector<8x16xf32>
    %25 = vector.extract_strided_slice %24 {offsets = [0, 0], sizes = [1, 16], strides = [1, 1]} : vector<8x16xf32> to vector<1x16xf32>
    %26 = vector.broadcast %7 : vector<1x1xf32> to vector<1x16xf32>
    %27 = arith.addf %25, %26 : vector<1x16xf32>
    %28 = arith.negf %27 : vector<1x16xf32>
    %29 = math.exp %28 : vector<1x16xf32>
    %cst_17 = arith.constant 1.000000e+00 : f32
    %30 = vector.broadcast %cst_17 : f32 to vector<1x16xf32>
    %31 = arith.addf %30, %29 : vector<1x16xf32>
    %32 = arith.divf %30, %31 : vector<1x16xf32>
    %33 = vector.shape_cast %32 : vector<1x16xf32> to vector<1x1x16xf32>
    %c0_18 = arith.constant 0 : index
    %c0_19 = arith.constant 0 : index
    %c0_20 = arith.constant 0 : index
    %34 = vector.load %arg8[%c0_18, %c0_19, %c0_20] : memref<1x1x16xf32, #tpu.memory_space<vmem>>, vector<1x1x16xf32>
    tpu.vector_store %arg8[%c0_18, %c0_19, %c0_20], %33 {strides = array<i32>} : memref<1x1x16xf32, #tpu.memory_space<vmem>>, vector<1x1x16xf32>,
    return
  }
  func.func @transform_0(%arg0: i32) -> (i32, i32) {
    %c0_i32 = arith.constant 0 : i32
    %c0_i32_0 = arith.constant 0 : i32
    return %arg0, %c0_i32 : i32, i32
  }
  func.func @transform_1(%arg0: i32) -> (i32, i32) {
    %c0_i32 = arith.constant 0 : i32
    %c0_i32_0 = arith.constant 0 : i32
    %c0_i32_1 = arith.constant 0 : i32
    return %c0_i32, %c0_i32_0 : i32, i32
  }
  func.func @transform_2(%arg0: i32) -> (i32, i32) {
    %c0_i32 = arith.constant 0 : i32
    %c0_i32_0 = arith.constant 0 : i32
    %c0_i32_1 = arith.constant 0 : i32
    return %c0_i32, %c0_i32_0 : i32, i32
  }
  func.func @transform_3(%arg0: i32) -> (i32, i32) {
    %c0_i32 = arith.constant 0 : i32
    %c0_i32_0 = arith.constant 0 : i32
    %c0_i32_1 = arith.constant 0 : i32
    return %c0_i32, %c0_i32_0 : i32, i32
  }
  func.func @transform_4(%arg0: i32) -> (i32, i32) {
    %c0_i32 = arith.constant 0 : i32
    %c0_i32_0 = arith.constant 0 : i32
    %c0_i32_1 = arith.constant 0 : i32
    return %c0_i32, %c0_i32_0 : i32, i32
  }
  func.func @transform_5(%arg0: i32) -> (i32, i32) {
    %c0_i32 = arith.constant 0 : i32
    %c0_i32_0 = arith.constant 0 : i32
    %c0_i32_1 = arith.constant 0 : i32
    return %c0_i32, %c0_i32_0 : i32, i32
  }
  func.func @transform_6(%arg0: i32) -> (i32, i32) {
    %c0_i32 = arith.constant 0 : i32
    %c0_i32_0 = arith.constant 0 : i32
    %c0_i32_1 = arith.constant 0 : i32
    return %c0_i32, %c0_i32_0 : i32, i32
  }
  func.func @transform_7(%arg0: i32) -> (i32, i32, i32) {
    %c0_i32 = arith.constant 0 : i32
    %c0_i32_0 = arith.constant 0 : i32
    %c0_i32_1 = arith.constant 0 : i32
    return %arg0, %c0_i32, %c0_i32_0 : i32, i32, i32
  }
}

</mosaic_0001>

<bundles_post_ra>
// kernel: tpu_custom_call.1
= control target key start
LH: loop header
LB: loop body
LE: loop exit
PB: predicated region body
PF: predicated region fallthrough
CT: control target
= control target key end

     0   :  { %6 = vsyncpa [#allocation3], 0  ;;  %s441_s0 = inlined_call_operand.hbm [shape: f32[8,128], index: 0, kind: input, shape index: {}]   ;;  %s442_s1 = inlined_call_operand.hbm [shape: f32[16,128], index: 1, kind: output, shape index: {}]  }
   0x1   :  { %7 = vsyncpa [#allocation4], 0 }
   0x2   :  { %9 = vsyncpa [#allocation4 + $0x1], 0  ;;  %s357_s6 = smov 0   ;;  %s359_s7 = smov 0  }
   0x3   :  { %s361_s8 = smov 0   ;;  %s363_s9 = smov 0  }
   0x4 LB: > { %s378_s10 = sadd.s32 4294967295, %s344_s9   ;;  %s188_s11 = sadd.s32 4294967294, %s344_s9   ;;  %s344_s9 = sphi %s363_s9, %s448_s9   ;;  %s340_s8 = sphi %s361_s8, %s447_s8   ;;  %s336_s7 = sphi %s359_s7, %s446_s7   ;;  %s332_s6 = sphi %s357_s6, %s445_s6  }
   0x5   : > { %s382_s12 = sadd.s32 1, %s344_s9   ;;  %s43_s13 = sadd.s32 1, %s340_s8 }
   0x6   : > { %s40_s14 = ssub.s32 %s344_s9, %s382_s12  ;;  %p53_p0 = scmp.ne.s32.totalorder %s340_s8, %s336_s7 }
   0x7   : > { %p41_p1 = scmp.eq.s32.totalorder %s40_s14, 0  ;;  %p54_p2 = scmp.eq.s32.totalorder %s378_s10, 1 }
   0x8   : > { %p59_p3 = scmp.ne.s32.totalorder %s336_s7, %s332_s6  ;;  %p60_p4 = scmp.eq.s32.totalorder %s188_s11, 1 }
   0x9   : > { %s393_s15 = scalar_select %p41_p1, %s340_s8, %s43_s13  }
   0xa   : > { %p395_p5 = por %p54_p2, %p53_p0  ;;  %p399_p6 = por %p60_p4, %p59_p3 }
   0xb   : > { %p189_p7 = scmp.ge.s32.totalorder %s344_s9, 1  ;;  %p67_p8 = scmp.lt.s32.totalorder %s344_s9, 3 }
   0xc   : > { %p212_p9 = scmp.eq.s32.totalorder %s378_s10, 0  ;;  %s79_s20 = sshll.u32 %s441_s0, 4  ;;  %s80_s20 = int_to_ptr.hbm [resolvable:$true] %s79_s20 }
   0xd   : > { %p68_p10 = pnand %p189_p7, %p67_p8  ;;  %s346_s21 = smov [#allocation2]  }
   0xe   : > { %s81_s22 = sshll.u32 %s346_s21, 4  ;;  %s82_s22 = int_to_ptr.vmem [resolvable:$true] %s81_s22 }
   0xf   : > { %p204_p11 = pneg %p68_p10  ;;  %94 = sbr.rel (%p68_p10) target bundleno = 37 (0x25), region = 24 }
  0x11   : > { %p205_p12 = pnand %p212_p9, %p204_p11 }
  0x13   : > { %207 = dma.hbm_to_vmem [thread:$0]  (!%p205_p12), %s80_s20, 128, %s82_s22, [#allocation3]  }
  0x14   : > { %323 = dma.done.wait (%p212_p9), [#allocation3], 128  }
  0x15   : > { %325 = vsyncadd (%p212_p9), [#allocation3], 4294967168  ;;  %s107_s23 = sand.u32 1, %s336_s7   ;;  %s195_s24 = sshll.u32 %s378_s10, 3  ;;  %v110_v0 = vld [vmem:[#allocation2] sm:$0xff] }
  0x16   : > { %s193_s25 = sshll.u32 %s107_s23, 3  ;;  %s124_s28 = scalar_lea.hbm %s442_s1, %s195_s24  ;;  %v111_v1 = vmul.f32 2.0, %v110_v0 }
  0x17   : > { %s109_s29 = scalar_lea.vmem [#allocation5], %s193_s25  ;;  %s128_s2 = sshll.u32 %s124_s28, 4  ;;  %s129_s2 = int_to_ptr.hbm [resolvable:$true] %s128_s2 }
  0x18   : > { %s126_s30 = sshll.u32 %s109_s29, 4  ;;  %112 = vst [vmem:[%s109_s29] sm:$0xff] %v111_v1  ;;  %s114_s3 = scalar_lea.sflag [#allocation4], %s107_s23  ;;  %s127_s30 = int_to_ptr.vmem [resolvable:$true] %s126_s30 }
  0x19   : > { %s292_s4 = sshra.s32 %s129_s2, 4  ;;  %s298_s13 = scalar_lea.hbm %s442_s1, 16  ;;  %s293_s4 = int_to_ptr.hbm [resolvable:$true] %s292_s4 }
  0x1a   : > { %s294_s5 = scalar_lea.hbm %s293_s4, 8  ;;  %p299_p2 = scmp.lt.s32.totalorder %s293_s4, %s442_s1 }
  0x1b   : > { %p295_p13 = scmp.ne.s32.totalorder %s293_s4, %s294_s5  ;;  %p300_p3 = scmp.lt.s32.totalorder %s298_s13, %s294_s5 }
  0x1d   : > { %p296_p0 = pnand %p295_p13, %p395_p5  ;;  %p301_p4 = por %p300_p3, %p299_p2 }
  0x1f   : > { %p297_p1 = pneg %p296_p0 }
  0x21   : > { %p302_p7 = pnand %p301_p4, %p297_p1 }
  0x23   : > { %305 = shalt.err (!%p302_p7)
}
  0x24   : > { %202 = dma.vmem_to_hbm [thread:$0]  (%p395_p5), %s127_s30, 128, %s129_s2, %s114_s3  }
  0x25 PF: > { %p214_p8 = scmp.ge.s32.totalorder %s344_s9, 2  ;;  %s140_s19 = sand.u32 1, %s332_s6  }
  0x26   : > { %s141_s20 = scalar_lea.sflag [#allocation4], %s140_s19 }
  0x27   : > { %p209_p9 = pnand %p214_p8, %p399_p6 }
  0x29   : > { %p210_p10 = pneg %p209_p9 }
  0x2b   : > { %327 = dma.done.wait (%p210_p10), %s141_s20, 128  }
  0x2c   : > { %329 = vsyncadd (%p210_p10), %s141_s20, 4294967168  ;;  %p12_p11 = scmp.ge.s32.totalorder %s382_s12, 4   ;;  %s445_s6 = smov %s336_s7 }
  0x2d   : > { %s446_s7 = smov %s340_s8  ;;  %s447_s8 = smov %s393_s15 }
  0x2e   : > { %s448_s9 = smov %s382_s12  ;;  %14 = sbr.rel (!%p12_p11) target bundleno = 4 (0x4), region = 61 }
  0x33   :  { %147 = vsyncpa [#allocation3], 1 }
  0x34   :  { %149 = vsyncpa [#allocation3 + $0x1], 1 }
  0x35   :  { %150 = vsyncpa [#allocation4], 1 }
  0x36   :  { %152 = vsyncpa [#allocation4 + $0x1], 1 }

// kernel: linear_discriminator.1
= control target key start
LH: loop header
LB: loop body
LE: loop exit
PB: predicated region body
PF: predicated region fallthrough
CT: control target
= control target key end

     0   :  { %s572_s0 = inlined_call_operand.hbm [shape: f32[16,64], index: 0, kind: input, shape index: {}]   ;;  %s573_s1 = inlined_call_operand.hbm [shape: bf16[64,128], index: 1, kind: input, shape index: {}]   ;;  %s574_s2 = inlined_call_operand.vmem [shape: f32[1,128], index: 2, kind: input, shape index: {}]   ;;  %s575_s3 = inlined_call_operand.hbm [shape: bf16[128,128], index: 3, kind: input, shape index: {}]   ;;  %s576_s4 = inlined_call_operand.vmem [shape: f32[1,128], index: 4, kind: input, shape index: {}]   ;;  %s577_s5 = inlined_call_operand.vmem [shape: bf16[8,128], index: 5, kind: input, shape index: {}]   ;;  %s578_s6 = inlined_call_operand.<no memory space> [shape: f32[1,1], index: 6, kind: input, shape index: {}]   ;;  %s579_s7 = inlined_call_operand.hbm [shape: f32[1,1,16], index: 7, kind: output, shape index: {}]  }
   0x1   :  { %v12_v0 = vstv %s578_s6 }
   0x2   :  { %13 = vst [vmem:[#allocation2] sm:$0x1] %v12_v0 }
   0x3   :  { %14 = vsyncpa [#allocation4], 0 }
   0x4   :  { %15 = vsyncpa [#allocation7], 0  ;;  %s34_s28 = sshll.u32 %s573_s1, 4  ;;  %s35_s28 = int_to_ptr.hbm [resolvable:$true] %s34_s28 }
   0x5   :  { %16 = vsyncpa [#allocation5], 0  ;;  %s499_s29 = smov [#allocation6]   ;;  %s21_s10 = sshll.u32 %s572_s0, 4  ;;  %s22_s10 = int_to_ptr.hbm [resolvable:$true] %s21_s10 }
   0x6   :  { %s36_s30 = sshll.u32 %s499_s29, 4  ;;  %s500_s11 = smov 64   ;;  %s37_s30 = int_to_ptr.vmem [resolvable:$true] %s36_s30 }
   0x7   :  { %s501_s12 = smov 4   ;;  %s502_s6 = smov [#allocation3]  }
   0x8   :  { %42 = dma.hbm_to_vmem [thread:$0]  %s35_s28, 512, %s37_s30, [#allocation7], %s500_s11, %s500_s11, %s501_s12  }
   0x9   :  { %s23_s13 = sshll.u32 %s502_s6, 4  ;;  %s503_s14 = smov 128   ;;  %s24_s13 = int_to_ptr.vmem [resolvable:$true] %s23_s13 }
   0xa   :  { %s504_s15 = smov 8   ;;  %s49_s17 = sshll.u32 %s575_s3, 4  ;;  %s50_s17 = int_to_ptr.hbm [resolvable:$true] %s49_s17 }
   0xb   :  { %29 = dma.hbm_to_vmem [thread:$0]  %s22_s10, 256, %s24_s13, [#allocation4], %s503_s14, %s503_s14, %s504_s15  }
   0xc   :  { %s505_s18 = smov [#allocation8]  }
   0xd   :  { %s51_s19 = sshll.u32 %s505_s18, 4  ;;  %s52_s19 = int_to_ptr.vmem [resolvable:$true] %s51_s19 }
   0xe   :  { %57 = dma.hbm_to_vmem [thread:$0]  %s50_s17, 1024, %s52_s19, [#allocation7], %s500_s11, %s500_s11, %s501_s12  }
   0xf   :  { %493 = dma.done.wait [#allocation4], 256  }
  0x10   :  { %494 = vsyncadd [#allocation4], 4294967040 }
  0x11   :  { %495 = dma.done.wait [#allocation7], 1536  }
  0x12   :  { %496 = vsyncadd [#allocation7], 4294965760  ;;  %v374_v1 = vld [vmem:[#allocation6 + $0x18] sm:$0xff]  ;;  %v373_v2 = vld [vmem:[#allocation6 + $0x10] sm:$0xff]  ;;  %vm134_vm0 = vcmask 523264   ;;  %v506_v46 = vmov 0  }
  0x13   :  { %142 = vmatpush.bf16.msra.mxu0 %v374_v1  ;;  %v382_v3 = vld [vmem:[#allocation8 + $0x38] sm:$0xff]  ;;  %v381_v4 = vld [vmem:[#allocation8 + $0x30] sm:$0xff]  ;;  %v372_v5 = vld [vmem:[#allocation6 + $0x8] sm:$0xff]  ;;  %392 = vset.pattern.permute.xlu0 %v506_v46  ;;  %s507_s22 = smov [#allocation9]   ;;  %s310_s25 = sshll.u32 %s579_s7, 4  ;;  %vm301_vm4 = vcmask 122880   ;;  %s311_s25 = int_to_ptr.hbm [resolvable:$true] %s310_s25 }
  0x14   :  { %224 = vmatpush.bf16.msra.mxu1 %v382_v3  ;;  %v371_v6 = vld [vmem:[#allocation6] sm:$0xff]  ;;  %v107_v7 = vld [vmem:[#allocation3] sm:$0xff]  ;;  %v108_v8 = vld [vmem:[#allocation3 + $0x8] sm:$0xff] }
  0x15   :  { %v109_v9 = vpack.c.bf16 %v108_v8, %v107_v7  ;;  %v380_v10 = vld [vmem:[#allocation8 + $0x28] sm:$0xff]  ;;  %v379_v11 = vld [vmem:[#allocation8 + $0x20] sm:$0xff]  ;;  %v378_v12 = vld [vmem:[#allocation8 + $0x18] sm:$0xff] }
  0x16   :  { %v377_v13 = vld [vmem:[#allocation8 + $0x10] sm:$0xff]  ;;  %v376_v14 = vld [vmem:[#allocation8 + $0x8] sm:$0xff]  ;;  %v375_v16 = vld [vmem:[#allocation8] sm:$0xff] }
  0x17   :  { %143 = vmatpush.bf16.msra.mxu0 %v373_v2  ;;  %v102_v15 = vld [vmem:[%s574_s2] sm:$0x1] }
  0x18   :  { %225 = vmatpush.bf16.msra.mxu1 %v381_v4  ;;  %v103_v17 = vpack.c.bf16 %v102_v15, %v102_v15  ;;  %v104_v38 = vld [vmem:[%s576_s4] sm:$0x1] }
  0x19   :  { %v105_v39 = vpack.c.bf16 %v104_v38, %v104_v38  ;;  %v106_v43 = vld [vmem:[#allocation2] sm:$0x1] }
  0x1a   :  { %v155_v18 = vpack.i.b16 %v103_v17, %v103_v17  ;;  %277 = vperm.xlu0 %392, %v106_v43   ;;  %v101_v62 = vld [vmem:[%s577_s5] sm:$0xf]  ;;  %s308_s5 = sshll.u32 %s507_s22, 4  ;;  %s309_s5 = int_to_ptr.vmem [resolvable:$true] %s308_s5 }
  0x1b   :  { %144 = vmatpush.bf16.msra.mxu0 %v372_v5  ;;  %v241_v40 = vpack.i.b16 %v105_v39, %v105_v39 }
  0x1c   :  { %226 = vmatpush.bf16.msra.mxu1 %v380_v10  ;;  %v157_v19 = vperm.slane %v155_v18, 0 }
  0x1d   :  { %v243_v41 = vperm.slane %v241_v40, 0 }
  0x1e   :  { %v160_v22 = vunpack.c.l.bf16 %v157_v19 }
  0x1f   :  { %145 = vmatpush.bf16.msra.mxu0 %v371_v6  ;;  %v246_v45 = vunpack.c.l.bf16 %v243_v41 }
  0x20   :  { %227 = vmatpush.bf16.msra.mxu1 %v379_v11 }
  0x22   :  { %337 = vmatmul.msk.bf16.vlgmr.msra.gmra.mxu0 %vm134_vm0, %v109_v9 }
  0x24   :  { %228 = vmatpush.bf16.msra.mxu1 %v378_v12 }
  0x28   :  { %229 = vmatpush.bf16.msra.mxu1 %v377_v13 }
  0x2c   :  { %230 = vmatpush.bf16.msra.mxu1 %v376_v14 }
  0x30   :  { %231 = vmatpush.bf16.msra.mxu1 %v375_v16 }
  0x8c   :  { %v278_v63 = vpop.permute.xlu0 %277 }
  0x8d   :  { %v280_v0 = vperm.slane %v278_v63, 0 }
  0x9f   :  { %v147_v20 = vpop.f32.mrf.mxu0 }
  0xa0   :  { %v152_v21 = vpack.c.bf16 %v147_v20, %v147_v20 }
  0xa2   :  { %v158_v23 = vunpack.c.l.bf16 %v152_v21 }
  0xa4   :  { %v161_v24 = vadd.f32 %v160_v22, %v158_v23 }
  0xa6   :  { %v163_v26 = vpack.c.bf16 %v161_v24, %v161_v24 }
  0xa7   :  { %v149_v25 = vpop.f32.mrf.mxu0 }
  0xa8   :  { %v153_v27 = vpack.c.bf16 %v149_v25, %v149_v25  ;;  %v165_v29 = vunpack.c.l.bf16 %v163_v26 }
  0xaa   :  { %v159_v28 = vunpack.c.l.bf16 %v153_v27  ;;  %v167_v33 = vmul.f32 0.20019531, %v165_v29 }
  0xac   :  { %v162_v30 = vadd.f32 %v160_v22, %v159_v28  ;;  %v173_v35 = vmax.f32 %v165_v29, %v167_v33 }
  0xae   :  { %v164_v31 = vpack.c.bf16 %v162_v30, %v162_v30 }
  0xb0   :  { %v166_v32 = vunpack.c.l.bf16 %v164_v31 }
  0xb2   :  { %v168_v34 = vmul.f32 0.20019531, %v166_v32 }
  0xb4   :  { %v174_v36 = vmax.f32 %v166_v32, %v168_v34 }
  0xb6   :  { %v175_v37 = vpack.c.bf16 %v174_v36, %v173_v35 }
  0xb8   :  { %232 = vmatmul.bf16.vlgmr.msra.gmra.mxu1 %v175_v37 }
 0x135   :  { %v233_v42 = vpop.f32.mrf.mxu1 }
 0x136   :  { %v238_v44 = vpack.c.bf16 %v233_v42, %v233_v42 }
 0x138   :  { %v244_v47 = vunpack.c.l.bf16 %v238_v44 }
 0x13a   :  { %v247_v48 = vadd.f32 %v246_v45, %v244_v47 }
 0x13c   :  { %v249_v50 = vpack.c.bf16 %v247_v48, %v247_v48 }
 0x13d   :  { %v235_v49 = vpop.f32.mrf.mxu1 }
 0x13e   :  { %v239_v51 = vpack.c.bf16 %v235_v49, %v235_v49  ;;  %v251_v54 = vunpack.c.l.bf16 %v249_v50 }
 0x140   :  { %v245_v52 = vunpack.c.l.bf16 %v239_v51  ;;  %v253_v57 = vmul.f32 0.20019531, %v251_v54 }
 0x142   :  { %v248_v53 = vadd.f32 %v246_v45, %v245_v52  ;;  %v259_v59 = vmax.f32 %v251_v54, %v253_v57 }
 0x144   :  { %v250_v55 = vpack.c.bf16 %v248_v53, %v248_v53 }
 0x146   :  { %v252_v56 = vunpack.c.l.bf16 %v250_v55 }
 0x148   :  { %v254_v58 = vmul.f32 0.20019531, %v252_v56 }
 0x14a   :  { %v260_v60 = vmax.f32 %v252_v56, %v254_v58 }
 0x14c   :  { %v261_v61 = vpack.c.bf16 %v260_v60, %v259_v59 }
 0x14e   :  { %269 = vmatpush.bf16.xpose.msra.mxu2 %v261_v61 }
 0x155   :  { %270 = vmatmul.bf16.vlgmr.msra.gmra.mxu2 %v101_v62 }
 0x1d8   :  { %v271_v1 = vpop.f32.mrf.mxu2 }
 0x1d9   :  { %v281_v2 = vadd.f32 %v280_v0, %v271_v1 }
 0x1db   :  { %v370_v3 = vmul.f32 -1.442695, %v281_v2 }
 0x1dd   :  { %393 = vpow2.f32 %v370_v3 }
 0x1e0   :  { %v273_v4 = vpop.f32.mrf.mxu2 }
 0x1e3   :  { %v394_v5 = vpop.eup %393 }
 0x1e4   :  { %v285_v6 = vadd.f32 1.0, %v394_v5 }
 0x1e6   :  { %395 = vrcp.f32 %v285_v6  ;;  %v297_v10 = vand.u32 2147483648, %v285_v6  ;;  %v295_v12 = vand.u32 2147483647, %v285_v6  ;;  %vm291_vm2 = vweird.f32 %v285_v6 }
 0x1e8   :  { %v298_v14 = vor.u32 1.1754944e-38, %v297_v10  ;;  %vm296_vm5 = vcmp.eq.f32.partialorder %v295_v12, 8.507059e+37 }
 0x1ec   :  { %v396_v7 = vpop.eup %395 }
 0x1ed   :  { %v287_v8 = vmul.f32 %v396_v7, %v285_v6  ;;  %vm292_vm1 = vweird.f32 %v396_v7 }
 0x1ee   :  { %vm293_vm3 = vmor %vm291_vm2, %vm292_vm1 }
 0x1ef   :  { %v288_v9 = vsub.f32 1.0, %v287_v8 }
 0x1f1   :  { %v289_v11 = vmul.f32 %v396_v7, %v288_v9 }
 0x1f3   :  { %v290_v13 = vadd.f32 %v396_v7, %v289_v11 }
 0x1f5   :  { %v294_v15 = vsel %vm293_vm3, %v396_v7, %v290_v13 }
 0x1f6   :  { %v299_v16 = vsel %vm296_vm5, %v298_v14, %v294_v15 }
 0x1f7   :  { %302 = vst.msk [vmem:[#allocation9] sm:$0x1] %vm301_vm4, %v299_v16 }
 0x1f8   :  { %313 = dma.vmem_to_hbm [thread:$0]  %s309_s5, 16, %s311_s25, [#allocation5]  }
 0x1f9   :  { %497 = dma.done.wait [#allocation5], 16  }
 0x1fa   :  { %498 = vsyncadd [#allocation5], 4294967280 }
 0x1fb   :  { %318 = vsyncpa [#allocation4], 1 }
 0x1fc   :  { %319 = vsyncpa [#allocation7], 1 }
 0x1fd   :  { %320 = vsyncpa [#allocation5], 1 }

</bundles_post_ra>
